<compile_context>
chip_gen: v6e
topology: v6e:2x2x1
jax: 0.10.0
libtpu: 0.0.40
codegen_flags: <defaults>
</compile_context>

<pallas_src>
import functools

import numpy as np
import jax
import jax.numpy as jnp
from jax.experimental import pallas as pl
from jax.experimental.pallas import tpu as pltpu


def _round_up(x, m):
    return ((x + m - 1) // m) * m


_FW_STATIC_UNROLL_MAX = 64   # static unroll below this; scratch-ref + fori_loop above


# --------------------- exact 3x bf16 table split (glue) ----------------------

def _trunc_low16(v):
    """Zero the low 16 bits of an f32 array's representation (exact, no rounding)."""
    bits = jax.lax.bitcast_convert_type(v, jnp.uint32)
    return jax.lax.bitcast_convert_type(bits & jnp.uint32(0xFFFF0000), jnp.float32)


def _exact_bf16_split3(t):
    """Split f32 `t` into (hi, mid, lo) bf16 with t == hi + mid + lo exactly.

    Truncation (not rounding) means the three components' significand bits are
    disjoint subsets of t's 24-bit significand, so every partial sum is exact in
    f32 and a one-hot bf16 matmul against the three parts is a bit-exact gather.
    (Assumes t has no f32 subnormals -- true for N(0,1) embedding tables.)
    """
    hi = _trunc_low16(t)
    r1 = t - hi
    mid = _trunc_low16(r1)
    lo = r1 - mid
    return (hi.astype(jnp.bfloat16), mid.astype(jnp.bfloat16), lo.astype(jnp.bfloat16))


# ----------------------------- kernels ---------------------------------------

def _fw_nodefeat_kernel(adj_ref, degs_ref, x_ref, deg_tab_ref,
                        rel_pos_ref, node_feat_ref, *scratch, unreach_idx):
    n = adj_ref.shape[0]
    adj = adj_ref[...]                                           # [N, N] f32 in {0, 1}

    # ---- Floyd-Warshall init: diag=0, edge=1, else 510 ----------------------
    row = jax.lax.broadcasted_iota(jnp.int32, (n, n), 0)
    col = jax.lax.broadcasted_iota(jnp.int32, (n, n), 1)
    d0 = jnp.where(row == col, 0.0,
                   jnp.where(adj > 0.5, 1.0, 510.0)).astype(jnp.float32)

    if n <= _FW_STATIC_UNROLL_MAX:
        # Small graphs: value-resident classic FW, statically unrolled (pure VPU
        # broadcast-add + min per step, no [N,N,N] intermediate).
        d = d0
        for k in range(n):
            d = jnp.minimum(d, d[:, k:k + 1] + d[k:k + 1, :])
    else:
        # Large graphs: keep d in a VMEM scratch ref and use lax.fori_loop so the
        # live set stays a few vregs (no spills / compile-time blowup at N >~ 100).
        d_scr, = scratch
        d_scr[...] = d0

        def body(k, carry):
            lane = jax.lax.broadcasted_iota(jnp.int32, (n, n), 1)
            # Pivot column d[:, k] via masked lane-reduce (robust lowering).
            # TODO(synk): a strided dynamic lane load d_scr[:, pl.ds(k, 1)] would
            # remove this extra pass once that lowering is verified on Mosaic.
            col_k = jnp.sum(jnp.where(lane == k, d_scr[...], 0.0),
                            axis=1, keepdims=True)               # [N, 1]
            row_k = d_scr[pl.ds(k, 1), :]                        # [1, N] dyn-sublane load
            d_scr[...] = jnp.minimum(d_scr[...], col_k + row_k)
            return carry

        jax.lax.fori_loop(0, n, body, 0, unroll=4)
        d = d_scr[...]

    # clamp, then remap the 510 "unreachable" sentinel to the compact table index
    rel = jnp.minimum(d, 510.0).astype(jnp.int32)
    rel_pos_ref[...] = jnp.where(rel >= 510, jnp.int32(unreach_idx), rel)

    # ---- node feature: fused one-hot degree gather (exact 3x bf16 MXU) ------
    degs = degs_ref[...]                                         # [N, 2] int32
    in_deg = degs[:, 0:1]                                        # torch sum(dim=1)
    out_deg = degs[:, 1:2]                                       # torch sum(dim=0)
    v = deg_tab_ref.shape[1] // 2                                # compact degree vocab
    ids = jax.lax.broadcasted_iota(jnp.int32, (n, 2 * v), 1)     # [N, 2V]
    hot = jnp.logical_or(ids == in_deg, (ids - v) == out_deg)
    onehot = jnp.where(hot, 1.0, 0.0).astype(jnp.bfloat16)       # exact in bf16
    emb = (jnp.dot(onehot, deg_tab_ref[0], preferred_element_type=jnp.float32)
           + jnp.dot(onehot, deg_tab_ref[1], preferred_element_type=jnp.float32)
           + jnp.dot(onehot, deg_tab_ref[2], preferred_element_type=jnp.float32))
    node_feat_ref[...] = x_ref[...] + emb


def _bias_kernel(rp_ref, tab3_ref, t_col_ref, o_ref):
    # rp_ref:    [1, TP]   compacted shortest-path indices (lane-dense position slab)
    # tab3_ref:  [3, H, V] hi/mid/lo bf16 split of the compact rel_pos table (transposed)
    # t_col_ref: [H, 1]    graph_token_virtual_distance weight (per-head column)
    # o_ref:     [H, TP]   int32 attention bias (lane-dense output)
    rp = rp_ref[...]                                              # [1, TP]
    neg = jnp.where(rp >= 20, jnp.int32(-99999999), jnp.int32(0))  # [1, TP]
    v = tab3_ref.shape[2]
    tp = rp.shape[1]
    ids = jax.lax.broadcasted_iota(jnp.int32, (v, tp), 0)          # [V, TP]
    onehot = jnp.where(ids == rp, 1.0, 0.0).astype(jnp.bfloat16)   # [V, TP]
    rel_bias = (jnp.dot(tab3_ref[0], onehot, preferred_element_type=jnp.float32)
                + jnp.dot(tab3_ref[1], onehot, preferred_element_type=jnp.float32)
                + jnp.dot(tab3_ref[2], onehot, preferred_element_type=jnp.float32))
    # PyTorch: float slice-assigned into an int32 tensor -> trunc toward zero.
    b2 = (neg.astype(jnp.float32) + rel_bias).astype(jnp.int32)    # [H, TP]
    b3 = (b2.astype(jnp.float32) + t_col_ref[...]).astype(jnp.int32)
    o_ref[...] = b3 + neg


# ----------------------------- wrapper ----------------------------------------

def init_params(key, num_heads, dim_node, dim_edge, dim_atten):
    k1, k2, k3, k4, k5 = jax.random.split(key, 5)
    return {
        # nn.Embedding default init N(0,1); padding_idx=0 row zeroed.
        "in_degree_encoder":
            jax.random.normal(k1, (512, dim_atten), jnp.float32).at[0].set(0.0),
        "out_degree_encoder":
            jax.random.normal(k2, (512, dim_atten), jnp.float32).at[0].set(0.0),
        "rel_pos_encoder":
            jax.random.normal(k3, (512, num_heads), jnp.float32).at[0].set(0.0),
        "graph_token_virtual_distance":
            jax.random.normal(k4, (1, num_heads), jnp.float32),
        # edge_encoder only feeds `edge_input`, which the PyTorch forward discards.
        "edge_encoder":
            jax.random.normal(k5, (dim_edge, num_heads), jnp.float32).at[0].set(0.0),
    }


def get_atten_bias_forward(params, x, edge_feature, edge_index, num_heads):
    N, dim_atten = x.shape
    H = num_heads

    # adjacency scatter + degree reductions (glue; fuses with the scatter in XLA,
    # and removes the in-kernel [N,N] transpose previously needed for out-degree)
    adj = jnp.zeros((N, N), dtype=bool).at[edge_index[0], edge_index[1]].set(True)
    adj_f = adj.astype(jnp.float32)
    degs = jnp.stack([jnp.sum(adj, axis=1), jnp.sum(adj, axis=0)],
                     axis=1).astype(jnp.int32)                         # [N, 2]

    # Compact degree table (degrees <= N): stack [in; out], exact hi/mid/lo bf16 split.
    v_deg = min(_round_up(N + 1, 16), 512)
    deg_tab = jnp.concatenate([params["in_degree_encoder"][:v_deg],
                               params["out_degree_encoder"][:v_deg]], axis=0)
    deg_tab3 = jnp.stack(_exact_bf16_split3(deg_tab), axis=0)          # [3, 2V, D] bf16

    unreach = max(N, 20)          # compact index for the 510 sentinel; >= 20 keeps the
                                  # (rel_pos >= 20) mask semantics intact.
    vmem_cap = (32 if N <= 256 else 64) * 1024 * 1024
    scratch = [pltpu.VMEM((N, N), jnp.float32)] if N > _FW_STATIC_UNROLL_MAX else []

    # ---- kernel A: fused Floyd-Warshall + node feature (no grid -> whole arrays
    #      resident in VMEM, single-buffered: friendlier to v7x's 64 MiB VMEM) ----
    rel_pos, node_feature = pl.pallas_call(
        functools.partial(_fw_nodefeat_kernel, unreach_idx=unreach),
        out_shape=(jax.ShapeDtypeStruct((N, N), jnp.int32),
                   jax.ShapeDtypeStruct((N, dim_atten), jnp.float32)),
        scratch_shapes=scratch,
        compiler_params=pltpu.CompilerParams(vmem_limit_bytes=vmem_cap),
    )(adj_f, degs, x, deg_tab3)

    # Compact rel_pos table: rows 0..N-1 plus row 510 placed at index `unreach`,
    # transposed to [H, V] (lane-dense) and split into an exact bf16 triple.
    V = _round_up(unreach + 1, 16)
    gather_idx = jnp.minimum(jnp.arange(V), 511).at[unreach].set(510)
    rp_tab_t = jnp.transpose(params["rel_pos_encoder"][gather_idx])     # [H, V]
    rp_tab3 = jnp.stack(_exact_bf16_split3(rp_tab_t), axis=0)           # [3, H, V] bf16
    t_col = jnp.transpose(params["graph_token_virtual_distance"])       # [H, 1]

    # ---- kernel B: attention bias, lane-dense [H, N*N], tiled over positions ----
    NN = N * N
    n_chunks = _round_up(NN, 128) // 128
    # >= 2 grid steps when possible (v7x has 2 TCs), <= 8192 lanes per step.
    chunks_per_tile = max(1, min(64, pl.cdiv(n_chunks, 2)))
    tile_p = 128 * chunks_per_tile
    grid_b = pl.cdiv(n_chunks, chunks_per_tile)
    nn_pad = tile_p * grid_b

    rp_flat = rel_pos.reshape(1, NN)
    if nn_pad != NN:
        # pad with index 0 (zeroed padding row of the table); sliced off below
        rp_flat = jnp.pad(rp_flat, ((0, 0), (0, nn_pad - NN)))

    bias = pl.pallas_call(
        _bias_kernel,
        out_shape=jax.ShapeDtypeStruct((H, nn_pad), jnp.int32),
        grid=(grid_b,),
        in_specs=[
            pl.BlockSpec((1, tile_p), lambda p: (0, p)),
            pl.BlockSpec((3, H, V), lambda p: (0, 0, 0)),
            pl.BlockSpec((H, 1), lambda p: (0, 0)),
        ],
        out_specs=pl.BlockSpec((H, tile_p), lambda p: (0, p)),
        compiler_params=pltpu.CompilerParams(
            dimension_semantics=("parallel",),
            vmem_limit_bytes=vmem_cap),
    )(rp_flat, rp_tab3, t_col)

    # Final layout permutation kept in glue: an extra HBM pass over 4*H*N^2 bytes,
    # still small next to the O(N^3) FW work (v5e item 10 trade-off documented).
    graph_attn_bias = jnp.transpose(bias[:, :NN].reshape(H, N, N), (1, 0, 2))  # [N, H, N]

    # TODO(synk): edge_feature / convert_to_single_emb / algos.gen_edge_input are
    # dead code in the reference forward (edge_input is never returned); skipped.
    del edge_feature

    return node_feature, graph_attn_bias


# ----------------------------- main --------------------------------------------

if __name__ == "__main__":
    num_heads, dim_node, dim_edge, dim_atten = 8, 32, 16, 32
    N, E = 16, 24

    key = jax.random.PRNGKey(0)
    kp, kx, ke, ki = jax.random.split(key, 4)
    params = init_params(kp, num_heads, dim_node, dim_edge, dim_atten)

    x = jax.random.normal(kx, (N, dim_atten), jnp.float32)
    edge_index = jax.random.randint(ki, (2, E), 0, N, dtype=jnp.int32)
    edge_feature = jax.random.randint(ke, (E,), 1, dim_edge, dtype=jnp.int32)

    node_feature, graph_attn_bias = get_atten_bias_forward(
        params, x, edge_feature, edge_index, num_heads)
    jax.block_until_ready((node_feature, graph_attn_bias))

    # ---- numpy reference checks ----
    ei = np.asarray(edge_index)
    adj_np = np.zeros((N, N), dtype=bool)
    adj_np[ei[0], ei[1]] = True
    M = np.where(adj_np, 1, 510).astype(np.int64)
    np.fill_diagonal(M, 0)
    for k in range(N):
        M = np.minimum(M, M[:, k:k + 1] + M[k:k + 1, :])
    M[M >= 510] = 510

    gab = np.asarray(graph_attn_bias)                            # [N, H, N]
    assert gab.shape == (N, num_heads, N) and gab.dtype == np.int32
    assert np.array_equal(gab[:, 0, :] < -1_000_000, M >= 20)

    # full bias reference with the same f32-add / trunc-toward-zero semantics
    rel_emb = np.asarray(params["rel_pos_encoder"])              # [512, H] f32
    t_np = np.asarray(params["graph_token_virtual_distance"]).reshape(1, num_heads, 1)
    attn_bias_np = np.where(M >= 20, -99999999, 0).astype(np.int32)
    b = np.repeat(attn_bias_np[:, None, :], num_heads, axis=1)   # int32 [N, H, N]
    rp_bias = rel_emb[M].transpose(0, 2, 1)                      # f32 [N, H, N]
    b = (b.astype(np.float32) + rp_bias).astype(np.int32)
    b = (b.astype(np.float32) + t_np).astype(np.int32)
    b = b + attn_bias_np[:, None, :]
    assert np.array_equal(gab, b)

    in_deg = adj_np.sum(axis=1)
    out_deg = adj_np.sum(axis=0)
    nf_ref = (np.asarray(x)
              + np.asarray(params["in_degree_encoder"])[in_deg]
              + np.asarray(params["out_degree_encoder"])[out_deg])
    nf = np.asarray(node_feature)
    assert nf.shape == (N, dim_atten) and nf.dtype == np.float32
    assert np.allclose(nf, nf_ref, rtol=1e-3, atol=1e-3)

    print("KERNEL_OK")
</pallas_src>

<mosaic_0001>
module attributes {stable_mosaic.version = 11 : i64} {
  func.func @_fw_nodefeat_kernel(%arg0: memref<16x16xf32, #tpu.memory_space<vmem>>, %arg1: memref<16x2xi32, #tpu.memory_space<vmem>>, %arg2: memref<16x32xf32, #tpu.memory_space<vmem>>, %arg3: memref<3x64x32xbf16, #tpu.memory_space<vmem>>, %arg4: memref<16x16xi32, #tpu.memory_space<vmem>>, %arg5: memref<16x32xf32, #tpu.memory_space<vmem>>) attributes {dimension_semantics = [], scalar_prefetch = 0 : i64, scratch_operands = 0 : i64, tpu.core_type = #tpu.core_type<tc>} {
    %c0 = arith.constant 0 : index
    %c0_0 = arith.constant 0 : index
    %0 = vector.load %arg0[%c0, %c0_0] : memref<16x16xf32, #tpu.memory_space<vmem>>, vector<16x16xf32>
    %1 = tpu.iota {dimensions = array<i32: 0>} : vector<16x16xi32>
    %2 = tpu.iota {dimensions = array<i32: 1>} : vector<16x16xi32>
    %3 = arith.cmpi eq, %1, %2 : vector<16x16xi32>
    %cst = arith.constant 5.000000e-01 : f32
    %4 = vector.broadcast %cst : f32 to vector<16x16xf32>
    %5 = arith.cmpf ogt, %0, %4 : vector<16x16xf32>
    %cst_1 = arith.constant 1.000000e+00 : f32
    %cst_2 = arith.constant 5.100000e+02 : f32
    %6 = vector.broadcast %cst_1 : f32 to vector<16x16xf32>
    %7 = vector.broadcast %cst_2 : f32 to vector<16x16xf32>
    %8 = arith.select %5, %6, %7 : vector<16x16xi1>, vector<16x16xf32>
    %cst_3 = arith.constant 0.000000e+00 : f32
    %9 = vector.broadcast %cst_3 : f32 to vector<16x16xf32>
    %10 = arith.select %3, %9, %8 : vector<16x16xi1>, vector<16x16xf32>
    %11 = vector.extract_strided_slice %10 {offsets = [0, 0], sizes = [16, 1], strides = [1, 1]} : vector<16x16xf32> to vector<16x1xf32>
    %12 = vector.extract_strided_slice %10 {offsets = [0, 0], sizes = [1, 16], strides = [1, 1]} : vector<16x16xf32> to vector<1x16xf32>
    %13 = vector.broadcast %11 : vector<16x1xf32> to vector<16x16xf32>
    %14 = vector.broadcast %12 : vector<1x16xf32> to vector<16x16xf32>
    %15 = arith.addf %13, %14 : vector<16x16xf32>
    %16 = arith.minimumf %10, %15 : vector<16x16xf32>
    %17 = vector.extract_strided_slice %16 {offsets = [0, 1], sizes = [16, 1], strides = [1, 1]} : vector<16x16xf32> to vector<16x1xf32>
    %18 = vector.extract_strided_slice %16 {offsets = [1, 0], sizes = [1, 16], strides = [1, 1]} : vector<16x16xf32> to vector<1x16xf32>
    %19 = vector.broadcast %17 : vector<16x1xf32> to vector<16x16xf32>
    %20 = vector.broadcast %18 : vector<1x16xf32> to vector<16x16xf32>
    %21 = arith.addf %19, %20 : vector<16x16xf32>
    %22 = arith.minimumf %16, %21 : vector<16x16xf32>
    %23 = vector.extract_strided_slice %22 {offsets = [0, 2], sizes = [16, 1], strides = [1, 1]} : vector<16x16xf32> to vector<16x1xf32>
    %24 = vector.extract_strided_slice %22 {offsets = [2, 0], sizes = [1, 16], strides = [1, 1]} : vector<16x16xf32> to vector<1x16xf32>
    %25 = vector.broadcast %23 : vector<16x1xf32> to vector<16x16xf32>
    %26 = vector.broadcast %24 : vector<1x16xf32> to vector<16x16xf32>
    %27 = arith.addf %25, %26 : vector<16x16xf32>
    %28 = arith.minimumf %22, %27 : vector<16x16xf32>
    %29 = vector.extract_strided_slice %28 {offsets = [0, 3], sizes = [16, 1], strides = [1, 1]} : vector<16x16xf32> to vector<16x1xf32>
    %30 = vector.extract_strided_slice %28 {offsets = [3, 0], sizes = [1, 16], strides = [1, 1]} : vector<16x16xf32> to vector<1x16xf32>
    %31 = vector.broadcast %29 : vector<16x1xf32> to vector<16x16xf32>
    %32 = vector.broadcast %30 : vector<1x16xf32> to vector<16x16xf32>
    %33 = arith.addf %31, %32 : vector<16x16xf32>
    %34 = arith.minimumf %28, %33 : vector<16x16xf32>
    %35 = vector.extract_strided_slice %34 {offsets = [0, 4], sizes = [16, 1], strides = [1, 1]} : vector<16x16xf32> to vector<16x1xf32>
    %36 = vector.extract_strided_slice %34 {offsets = [4, 0], sizes = [1, 16], strides = [1, 1]} : vector<16x16xf32> to vector<1x16xf32>
    %37 = vector.broadcast %35 : vector<16x1xf32> to vector<16x16xf32>
    %38 = vector.broadcast %36 : vector<1x16xf32> to vector<16x16xf32>
    %39 = arith.addf %37, %38 : vector<16x16xf32>
    %40 = arith.minimumf %34, %39 : vector<16x16xf32>
    %41 = vector.extract_strided_slice %40 {offsets = [0, 5], sizes = [16, 1], strides = [1, 1]} : vector<16x16xf32> to vector<16x1xf32>
    %42 = vector.extract_strided_slice %40 {offsets = [5, 0], sizes = [1, 16], strides = [1, 1]} : vector<16x16xf32> to vector<1x16xf32>
    %43 = vector.broadcast %41 : vector<16x1xf32> to vector<16x16xf32>
    %44 = vector.broadcast %42 : vector<1x16xf32> to vector<16x16xf32>
    %45 = arith.addf %43, %44 : vector<16x16xf32>
    %46 = arith.minimumf %40, %45 : vector<16x16xf32>
    %47 = vector.extract_strided_slice %46 {offsets = [0, 6], sizes = [16, 1], strides = [1, 1]} : vector<16x16xf32> to vector<16x1xf32>
    %48 = vector.extract_strided_slice %46 {offsets = [6, 0], sizes = [1, 16], strides = [1, 1]} : vector<16x16xf32> to vector<1x16xf32>
    %49 = vector.broadcast %47 : vector<16x1xf32> to vector<16x16xf32>
    %50 = vector.broadcast %48 : vector<1x16xf32> to vector<16x16xf32>
    %51 = arith.addf %49, %50 : vector<16x16xf32>
    %52 = arith.minimumf %46, %51 : vector<16x16xf32>
    %53 = vector.extract_strided_slice %52 {offsets = [0, 7], sizes = [16, 1], strides = [1, 1]} : vector<16x16xf32> to vector<16x1xf32>
    %54 = vector.extract_strided_slice %52 {offsets = [7, 0], sizes = [1, 16], strides = [1, 1]} : vector<16x16xf32> to vector<1x16xf32>
    %55 = vector.broadcast %53 : vector<16x1xf32> to vector<16x16xf32>
    %56 = vector.broadcast %54 : vector<1x16xf32> to vector<16x16xf32>
    %57 = arith.addf %55, %56 : vector<16x16xf32>
    %58 = arith.minimumf %52, %57 : vector<16x16xf32>
    %59 = vector.extract_strided_slice %58 {offsets = [0, 8], sizes = [16, 1], strides = [1, 1]} : vector<16x16xf32> to vector<16x1xf32>
    %60 = vector.extract_strided_slice %58 {offsets = [8, 0], sizes = [1, 16], strides = [1, 1]} : vector<16x16xf32> to vector<1x16xf32>
    %61 = vector.broadcast %59 : vector<16x1xf32> to vector<16x16xf32>
    %62 = vector.broadcast %60 : vector<1x16xf32> to vector<16x16xf32>
    %63 = arith.addf %61, %62 : vector<16x16xf32>
    %64 = arith.minimumf %58, %63 : vector<16x16xf32>
    %65 = vector.extract_strided_slice %64 {offsets = [0, 9], sizes = [16, 1], strides = [1, 1]} : vector<16x16xf32> to vector<16x1xf32>
    %66 = vector.extract_strided_slice %64 {offsets = [9, 0], sizes = [1, 16], strides = [1, 1]} : vector<16x16xf32> to vector<1x16xf32>
    %67 = vector.broadcast %65 : vector<16x1xf32> to vector<16x16xf32>
    %68 = vector.broadcast %66 : vector<1x16xf32> to vector<16x16xf32>
    %69 = arith.addf %67, %68 : vector<16x16xf32>
    %70 = arith.minimumf %64, %69 : vector<16x16xf32>
    %71 = vector.extract_strided_slice %70 {offsets = [0, 10], sizes = [16, 1], strides = [1, 1]} : vector<16x16xf32> to vector<16x1xf32>
    %72 = vector.extract_strided_slice %70 {offsets = [10, 0], sizes = [1, 16], strides = [1, 1]} : vector<16x16xf32> to vector<1x16xf32>
    %73 = vector.broadcast %71 : vector<16x1xf32> to vector<16x16xf32>
    %74 = vector.broadcast %72 : vector<1x16xf32> to vector<16x16xf32>
    %75 = arith.addf %73, %74 : vector<16x16xf32>
    %76 = arith.minimumf %70, %75 : vector<16x16xf32>
    %77 = vector.extract_strided_slice %76 {offsets = [0, 11], sizes = [16, 1], strides = [1, 1]} : vector<16x16xf32> to vector<16x1xf32>
    %78 = vector.extract_strided_slice %76 {offsets = [11, 0], sizes = [1, 16], strides = [1, 1]} : vector<16x16xf32> to vector<1x16xf32>
    %79 = vector.broadcast %77 : vector<16x1xf32> to vector<16x16xf32>
    %80 = vector.broadcast %78 : vector<1x16xf32> to vector<16x16xf32>
    %81 = arith.addf %79, %80 : vector<16x16xf32>
    %82 = arith.minimumf %76, %81 : vector<16x16xf32>
    %83 = vector.extract_strided_slice %82 {offsets = [0, 12], sizes = [16, 1], strides = [1, 1]} : vector<16x16xf32> to vector<16x1xf32>
    %84 = vector.extract_strided_slice %82 {offsets = [12, 0], sizes = [1, 16], strides = [1, 1]} : vector<16x16xf32> to vector<1x16xf32>
    %85 = vector.broadcast %83 : vector<16x1xf32> to vector<16x16xf32>
    %86 = vector.broadcast %84 : vector<1x16xf32> to vector<16x16xf32>
    %87 = arith.addf %85, %86 : vector<16x16xf32>
    %88 = arith.minimumf %82, %87 : vector<16x16xf32>
    %89 = vector.extract_strided_slice %88 {offsets = [0, 13], sizes = [16, 1], strides = [1, 1]} : vector<16x16xf32> to vector<16x1xf32>
    %90 = vector.extract_strided_slice %88 {offsets = [13, 0], sizes = [1, 16], strides = [1, 1]} : vector<16x16xf32> to vector<1x16xf32>
    %91 = vector.broadcast %89 : vector<16x1xf32> to vector<16x16xf32>
    %92 = vector.broadcast %90 : vector<1x16xf32> to vector<16x16xf32>
    %93 = arith.addf %91, %92 : vector<16x16xf32>
    %94 = arith.minimumf %88, %93 : vector<16x16xf32>
    %95 = vector.extract_strided_slice %94 {offsets = [0, 14], sizes = [16, 1], strides = [1, 1]} : vector<16x16xf32> to vector<16x1xf32>
    %96 = vector.extract_strided_slice %94 {offsets = [14, 0], sizes = [1, 16], strides = [1, 1]} : vector<16x16xf32> to vector<1x16xf32>
    %97 = vector.broadcast %95 : vector<16x1xf32> to vector<16x16xf32>
    %98 = vector.broadcast %96 : vector<1x16xf32> to vector<16x16xf32>
    %99 = arith.addf %97, %98 : vector<16x16xf32>
    %100 = arith.minimumf %94, %99 : vector<16x16xf32>
    %101 = vector.extract_strided_slice %100 {offsets = [0, 15], sizes = [16, 1], strides = [1, 1]} : vector<16x16xf32> to vector<16x1xf32>
    %102 = vector.extract_strided_slice %100 {offsets = [15, 0], sizes = [1, 16], strides = [1, 1]} : vector<16x16xf32> to vector<1x16xf32>
    %103 = vector.broadcast %101 : vector<16x1xf32> to vector<16x16xf32>
    %104 = vector.broadcast %102 : vector<1x16xf32> to vector<16x16xf32>
    %105 = arith.addf %103, %104 : vector<16x16xf32>
    %106 = arith.minimumf %100, %105 : vector<16x16xf32>
    %cst_4 = arith.constant 5.100000e+02 : f32
    %107 = vector.broadcast %cst_4 : f32 to vector<16x16xf32>
    %108 = arith.minimumf %106, %107 : vector<16x16xf32>
    %109 = arith.fptosi %108 : vector<16x16xf32> to vector<16x16xi32>
    %c510_i32 = arith.constant 510 : i32
    %110 = vector.broadcast %c510_i32 : i32 to vector<16x16xi32>
    %111 = arith.cmpi sge, %109, %110 : vector<16x16xi32>
    %c20_i32 = arith.constant 20 : i32
    %112 = vector.broadcast %c20_i32 : i32 to vector<16x16xi32>
    %113 = arith.select %111, %112, %109 : vector<16x16xi1>, vector<16x16xi32>
    %c0_5 = arith.constant 0 : index
    %c0_6 = arith.constant 0 : index
    %114 = vector.load %arg4[%c0_5, %c0_6] : memref<16x16xi32, #tpu.memory_space<vmem>>, vector<16x16xi32>
    tpu.vector_store %arg4[%c0_5, %c0_6], %113 {strides = array<i32>} : memref<16x16xi32, #tpu.memory_space<vmem>>, vector<16x16xi32>,
    %c0_7 = arith.constant 0 : index
    %c0_8 = arith.constant 0 : index
    %115 = vector.load %arg1[%c0_7, %c0_8] : memref<16x2xi32, #tpu.memory_space<vmem>>, vector<16x2xi32>
    %116 = vector.extract_strided_slice %115 {offsets = [0, 0], sizes = [16, 1], strides = [1, 1]} : vector<16x2xi32> to vector<16x1xi32>
    %117 = vector.extract_strided_slice %115 {offsets = [0, 1], sizes = [16, 1], strides = [1, 1]} : vector<16x2xi32> to vector<16x1xi32>
    %118 = tpu.iota {dimensions = array<i32: 1>} : vector<16x64xi32>
    %119 = vector.broadcast %116 : vector<16x1xi32> to vector<16x64xi32>
    %120 = arith.cmpi eq, %118, %119 : vector<16x64xi32>
    %c32_i32 = arith.constant 32 : i32
    %121 = vector.broadcast %c32_i32 : i32 to vector<16x64xi32>
    %122 = arith.subi %118, %121 : vector<16x64xi32>
    %123 = vector.broadcast %117 : vector<16x1xi32> to vector<16x64xi32>
    %124 = arith.cmpi eq, %122, %123 : vector<16x64xi32>
    %125 = arith.ori %120, %124 : vector<16x64xi1>
    %cst_9 = arith.constant 1.000000e+00 : f32
    %cst_10 = arith.constant 0.000000e+00 : f32
    %126 = vector.broadcast %cst_9 : f32 to vector<16x64xf32>
    %127 = vector.broadcast %cst_10 : f32 to vector<16x64xf32>
    %128 = arith.select %125, %126, %127 : vector<16x64xi1>, vector<16x64xf32>
    %129 = arith.truncf %128 : vector<16x64xf32> to vector<16x64xbf16>
    %c0_11 = arith.constant 0 : index
    %c0_12 = arith.constant 0 : index
    %c0_13 = arith.constant 0 : index
    %130 = vector.load %arg3[%c0_11, %c0_12, %c0_13] : memref<3x64x32xbf16, #tpu.memory_space<vmem>>, vector<1x64x32xbf16>
    %131 = vector.shape_cast %130 : vector<1x64x32xbf16> to vector<64x32xbf16>
    %cst_14 = arith.constant dense<0.000000e+00> : vector<16x32xf32>
    %132 = tpu.matmul %129, %131, %cst_14 {dimension_numbers = #tpu.dot_dimension_numbers<[1], [0], [0], [1], [0, 0, 1, 1], [], []>} : vector<16x64xbf16>, vector<64x32xbf16>, vector<16x32xf32> -> vector<16x32xf32>
    %c1 = arith.constant 1 : index
    %c0_15 = arith.constant 0 : index
    %c0_16 = arith.constant 0 : index
    %133 = vector.load %arg3[%c1, %c0_15, %c0_16] : memref<3x64x32xbf16, #tpu.memory_space<vmem>>, vector<1x64x32xbf16>
    %134 = vector.shape_cast %133 : vector<1x64x32xbf16> to vector<64x32xbf16>
    %cst_17 = arith.constant dense<0.000000e+00> : vector<16x32xf32>
    %135 = tpu.matmul %129, %134, %cst_17 {dimension_numbers = #tpu.dot_dimension_numbers<[1], [0], [0], [1], [0, 0, 1, 1], [], []>} : vector<16x64xbf16>, vector<64x32xbf16>, vector<16x32xf32> -> vector<16x32xf32>
    %136 = arith.addf %132, %135 : vector<16x32xf32>
    %c2 = arith.constant 2 : index
    %c0_18 = arith.constant 0 : index
    %c0_19 = arith.constant 0 : index
    %137 = vector.load %arg3[%c2, %c0_18, %c0_19] : memref<3x64x32xbf16, #tpu.memory_space<vmem>>, vector<1x64x32xbf16>
    %138 = vector.shape_cast %137 : vector<1x64x32xbf16> to vector<64x32xbf16>
    %cst_20 = arith.constant dense<0.000000e+00> : vector<16x32xf32>
    %139 = tpu.matmul %129, %138, %cst_20 {dimension_numbers = #tpu.dot_dimension_numbers<[1], [0], [0], [1], [0, 0, 1, 1], [], []>} : vector<16x64xbf16>, vector<64x32xbf16>, vector<16x32xf32> -> vector<16x32xf32>
    %140 = arith.addf %136, %139 : vector<16x32xf32>
    %c0_21 = arith.constant 0 : index
    %c0_22 = arith.constant 0 : index
    %141 = vector.load %arg2[%c0_21, %c0_22] : memref<16x32xf32, #tpu.memory_space<vmem>>, vector<16x32xf32>
    %142 = arith.addf %141, %140 : vector<16x32xf32>
    %c0_23 = arith.constant 0 : index
    %c0_24 = arith.constant 0 : index
    %143 = vector.load %arg5[%c0_23, %c0_24] : memref<16x32xf32, #tpu.memory_space<vmem>>, vector<16x32xf32>
    tpu.vector_store %arg5[%c0_23, %c0_24], %142 {strides = array<i32>} : memref<16x32xf32, #tpu.memory_space<vmem>>, vector<16x32xf32>,
    return
  }
}

</mosaic_0001>

<bundles_post_ra>
// kernel: tpu_custom_call.1
= control target key start
LH: loop header
LB: loop body
LE: loop exit
PB: predicated region body
PF: predicated region fallthrough
CT: control target
= control target key end

     0   :  { %11 = vsyncpa [#allocation3], 0  ;;  %v24_v2 = vlaneseq  ;;  %v829_v3 = vmov 0   ;;  %v830_v6 = vmov 510.0   ;;  %v831_v13 = vmov 1   ;;  %s1030_s0 = inlined_call_operand.vmem [shape: f32[16,16], index: 0, kind: input, shape index: {}]   ;;  %s1031_s1 = inlined_call_operand.vmem [shape: s32[16,2], index: 1, kind: input, shape index: {}]   ;;  %s1032_s2 = inlined_call_operand.vmem [shape: f32[16,32], index: 2, kind: input, shape index: {}]   ;;  %s1033_s3 = inlined_call_operand.vmem [shape: bf16[3,64,32], index: 3, kind: input, shape index: {}]   ;;  %s1034_s4 = inlined_call_operand.hbm [shape: s32[16,16], index: 4, kind: output, shape index: {0}]   ;;  %s1035_s5 = inlined_call_operand.hbm [shape: f32[16,32], index: 5, kind: output, shape index: {1}]  }
   0x1   :  { %v22_v0 = vld [vmem:[%s1030_s0] sm:$0xff]  ;;  %v23_v1 = vld [vmem:[%s1030_s0 + $0x8] sm:$0xff]  ;;  %736 = vset.pattern.permute.xlu0 %v829_v3  ;;  %743 = vset.pattern.permute.xlu1 %v831_v13 }
   0x2   :  { %vm31_vm0 = vcmp.gt.f32.partialorder %v22_v0, 0.5  ;;  %vm32_vm1 = vcmp.gt.f32.partialorder %v23_v1, 0.5  ;;  %v889_v4 = vshrl.u32 %v24_v2, 7  ;;  %v891_v5 = vand.u32 127, %v24_v2 }
   0x3   :  { %v33_v7 = vsel %vm31_vm0, 1.0, %v830_v6  ;;  %v34_v9 = vsel %vm32_vm1, 1.0, %v830_v6 }
   0x4   :  { %v26_v8 = vadd.s32 8, %v889_v4  ;;  %vm29_vm2 = vcmp.eq.s32.totalorder %v889_v4, %v891_v5 }
   0x5   :  { %v35_v10 = vsel %vm29_vm2, 0.0, %v33_v7 }
   0x6   :  { %vm30_vm3 = vcmp.eq.s32.totalorder %v26_v8, %v891_v5 }
   0x7   :  { %v36_v11 = vsel %vm30_vm3, 0.0, %v34_v9 }
   0x8   :  { %v737_v12 = vpack.i.bf16 %v36_v11, %v35_v10 }
   0xa   :  { %738 = vperm.xlu0 %736, %v737_v12  }
   0xb   :  { %12 = vsyncpa [#allocation5], 0  ;;  %v49_v14 = vsub.s32 0, %v889_v4  ;;  %v832_v21 = vmov 2   ;;  %v67_v22 = vsub.s32 1, %v889_v4  ;;  %v833_v29 = vmov 3  }
   0xc   :  { %v85_v31 = vsub.s32 2, %v889_v4  ;;  %v834_v39 = vmov 4   ;;  %v103_v40 = vsub.s32 3, %v889_v4  ;;  %v835_v48 = vmov 5  }
   0xd   :  { %v50_v15 = vrot.slane %v35_v10, %v49_v14  ;;  %v121_v49 = vsub.s32 4, %v889_v4  ;;  %v836_v55 = vmov 6   ;;  %v139_v58 = vsub.s32 5, %v889_v4 }
   0xe   :  { %742 = vset.pattern.permute.xlu0 %v831_v13  ;;  %v837_v2 = vmov 7   ;;  %v157_v6 = vsub.s32 6, %v889_v4  ;;  %vm843_vm4 = vmmov 0   ;;  %vm401_vm11 = vcmask 523264  }
   0xf   :  { %vm591_vm12 = vcmask 261120  }
  0x85   :  { %v739_v16 = vpop.permute.xlu0 %738 }
  0x86   :  { %v783_v17 = vadd.low.f32.bf16 %v50_v15, %v739_v16  ;;  %v784_v18 = vadd.high.f32.bf16 %v50_v15, %v739_v16  ;;  %v838_v16 = vmov 8  }
  0x88   :  { %v54_v19 = vmin.f32 %v36_v11, %v784_v18  ;;  %v53_v20 = vmin.f32 %v35_v10, %v783_v17  ;;  %v175_v17 = vsub.s32 7, %v889_v4 }
  0x8a   :  { %62 = vperm.xlu1 %743, %v54_v19   ;;  %57 = vperm.xlu0 %742, %v53_v20   ;;  %v68_v23 = vrot.slane %v53_v20, %v67_v22 }
  0x8e   :  { %744 = vset.pattern.permute.xlu1 %v832_v21  ;;  %745 = vset.pattern.permute.xlu0 %v833_v29 }
 0x105   :  { %v63_v24 = vpop.permute.xlu1 %62  ;;  %v58_v25 = vpop.permute.xlu0 %57 }
 0x106   :  { %v69_v26 = vadd.f32 %v68_v23, %v58_v25  ;;  %v70_v27 = vadd.f32 %v68_v23, %v63_v24  ;;  %v839_v24 = vmov 9  }
 0x108   :  { %v71_v28 = vmin.f32 %v53_v20, %v69_v26  ;;  %v72_v30 = vmin.f32 %v54_v19, %v70_v27 }
 0x10a   :  { %75 = vperm.xlu1 %744, %v71_v28   ;;  %v86_v32 = vrot.slane %v71_v28, %v85_v31 }
 0x10e   :  { %80 = vperm.xlu1 %744, %v72_v30  }
 0x112   :  { %746 = vset.pattern.permute.xlu1 %v833_v29 }
 0x185   :  { %v76_v33 = vpop.permute.xlu1 %75 }
 0x186   :  { %v87_v34 = vadd.f32 %v86_v32, %v76_v33 }
 0x188   :  { %v89_v35 = vmin.f32 %v71_v28, %v87_v34 }
 0x189   :  { %v81_v36 = vpop.permute.xlu1 %80 }
 0x18a   :  { %v88_v37 = vadd.f32 %v86_v32, %v81_v36  ;;  %93 = vperm.xlu0 %745, %v89_v35   ;;  %v104_v41 = vrot.slane %v89_v35, %v103_v40 }
 0x18c   :  { %v90_v38 = vmin.f32 %v72_v30, %v88_v37 }
 0x18e   :  { %98 = vperm.xlu1 %746, %v90_v38   ;;  %748 = vset.pattern.permute.xlu0 %v834_v39 }
 0x192   :  { %747 = vset.pattern.permute.xlu1 %v834_v39 }
 0x205   :  { %v94_v42 = vpop.permute.xlu0 %93 }
 0x206   :  { %v105_v43 = vadd.f32 %v104_v41, %v94_v42 }
 0x208   :  { %v107_v44 = vmin.f32 %v89_v35, %v105_v43  ;;  %v840_v35 = vmov 10   ;;  %v841_v43 = vmov 11  }
 0x209   :  { %v99_v45 = vpop.permute.xlu1 %98 }
 0x20a   :  { %v106_v46 = vadd.f32 %v104_v41, %v99_v45  ;;  %111 = vperm.xlu1 %747, %v107_v44   ;;  %v122_v50 = vrot.slane %v107_v44, %v121_v49 }
 0x20c   :  { %v108_v47 = vmin.f32 %v90_v38, %v106_v46 }
 0x20e   :  { %116 = vperm.xlu0 %748, %v108_v47   ;;  %749 = vset.pattern.permute.xlu1 %v835_v48 }
 0x212   :  { %750 = vset.pattern.permute.xlu0 %v836_v55 }
 0x285   :  { %v112_v51 = vpop.permute.xlu1 %111 }
 0x286   :  { %v123_v52 = vadd.f32 %v122_v50, %v112_v51 }
 0x288   :  { %v125_v53 = vmin.f32 %v107_v44, %v123_v52  ;;  %v336_v44 = vld [vmem:[%s1031_s1] sm:$0xff] }
 0x289   :  { %v117_v54 = vpop.permute.xlu0 %116 }
 0x28a   :  { %v124_v56 = vadd.f32 %v122_v50, %v117_v54  ;;  %129 = vperm.xlu1 %749, %v125_v53   ;;  %v140_v59 = vrot.slane %v125_v53, %v139_v58  ;;  %v842_v54 = vmov 0.0  }
 0x28b   :  { %673 = vmatprep.subr.bf16.mxu0 %v842_v54  ;;  %685 = vmatprep.subr.bf16.mxu1 %v842_v54 }
 0x28c   :  { %v126_v57 = vmin.f32 %v108_v47, %v124_v56  ;;  %v774_v56 = vld [vmem:[%s1033_s3 + $0x20] sm:$0xff]   ;;  %681 = vmatprep.mubr.msk.bf16.mxu0 %vm843_vm4, %v842_v54  ;;  %693 = vmatprep.mubr.msk.bf16.mxu1 %vm843_vm4, %v842_v54 }
 0x28e   :  { %134 = vperm.xlu1 %749, %v126_v57  }
 0x292   :  { %751 = vset.pattern.permute.xlu1 %v836_v55  ;;  %v773_v55 = vld [vmem:[%s1033_s3 + $0x28] sm:$0xff]  }
 0x305   :  { %v130_v60 = vpop.permute.xlu1 %129 }
 0x306   :  { %v141_v61 = vadd.f32 %v140_v59, %v130_v60  ;;  %v779_v60 = vld [vmem:[%s1033_s3 + $0x8] sm:$0xff]  }
 0x308   :  { %v143_v62 = vmin.f32 %v125_v53, %v141_v61  ;;  %v771_v53 = vld [vmem:[%s1033_s3 + $0x38] sm:$0xff]   ;;  %v781_v61 = vld [vmem:[%s1033_s3] sm:$0xff]  }
 0x309   :  { %v135_v63 = vpop.permute.xlu1 %134  ;;  %674 = vmatpush3.bf16.msra.mxu0 %v771_v53 }
 0x30a   :  { %v142_v0 = vadd.f32 %v140_v59, %v135_v63  ;;  %147 = vperm.xlu0 %750, %v143_v62   ;;  %v158_v7 = vrot.slane %v143_v62, %v157_v6  ;;  %675 = vmatprep.subr.bf16.mxu0 %v842_v54  ;;  %v844_v59 = vmov 12  }
 0x30c   :  { %v144_v1 = vmin.f32 %v126_v57, %v142_v0  ;;  %v777_v57 = vld [vmem:[%s1033_s3 + $0x10] sm:$0xff]  }
 0x30e   :  { %152 = vperm.xlu1 %751, %v144_v1   ;;  %753 = vset.pattern.permute.xlu0 %v837_v2 }
 0x312   :  { %752 = vset.pattern.permute.xlu1 %v837_v2 }
 0x385   :  { %v148_v8 = vpop.permute.xlu0 %147 }
 0x386   :  { %v159_v9 = vadd.f32 %v158_v7, %v148_v8  ;;  %v845_v8 = vmov 13  }
 0x388   :  { %v161_v10 = vmin.f32 %v143_v62, %v159_v9 }
 0x389   :  { %v153_v11 = vpop.permute.xlu1 %152 }
 0x38a   :  { %v160_v12 = vadd.f32 %v158_v7, %v153_v11  ;;  %165 = vperm.xlu1 %752, %v161_v10   ;;  %v176_v18 = vrot.slane %v161_v10, %v175_v17 }
 0x38c   :  { %v162_v15 = vmin.f32 %v144_v1, %v160_v12 }
 0x38e   :  { %170 = vperm.xlu0 %753, %v162_v15   ;;  %754 = vset.pattern.permute.xlu1 %v838_v16 }
 0x392   :  { %755 = vset.pattern.permute.xlu0 %v839_v24 }
 0x405   :  { %v166_v19 = vpop.permute.xlu1 %165 }
 0x406   :  { %v177_v20 = vadd.f32 %v176_v18, %v166_v19  ;;  %v776_v19 = vld [vmem:[%s1033_s3 + $0x58] sm:$0xff]  }
 0x408   :  { %v179_v21 = vmin.f32 %v161_v10, %v177_v20  ;;  %v626_v10 = vadd.s32 4294967264, %v891_v5 }
 0x409   :  { %v171_v23 = vpop.permute.xlu0 %170 }
 0x40a   :  { %v178_v25 = vadd.f32 %v176_v18, %v171_v23  ;;  %183 = vperm.xlu1 %754, %v179_v21   ;;  %v782_v23 = vld [vmem:[%s1033_s3 + $0x40] sm:$0xff]  }
 0x40c   :  { %v180_v26 = vmin.f32 %v162_v15, %v178_v25 }
 0x40e   :  { %188 = vperm.xlu1 %754, %v180_v26   ;;  %v194_v27 = vrot.slane %v180_v26, %v49_v14 }
 0x412   :  { %756 = vset.pattern.permute.xlu1 %v839_v24 }
 0x485   :  { %v184_v28 = vpop.permute.xlu1 %183 }
 0x486   :  { %v195_v29 = vadd.f32 %v194_v27, %v184_v28 }
 0x488   :  { %v197_v30 = vmin.f32 %v179_v21, %v195_v29  ;;  %v780_v21 = vld [vmem:[%s1033_s3 + $0x48] sm:$0xff]  }
 0x489   :  { %v189_v32 = vpop.permute.xlu1 %188 }
 0x48a   :  { %v196_v33 = vadd.f32 %v194_v27, %v189_v32  ;;  %201 = vperm.xlu0 %755, %v197_v30   ;;  %v846_v32 = vmov 14  }
 0x48c   :  { %v198_v34 = vmin.f32 %v180_v26, %v196_v33 }
 0x48e   :  { %206 = vperm.xlu1 %756, %v198_v34   ;;  %758 = vset.pattern.permute.xlu0 %v840_v35  ;;  %v212_v36 = vrot.slane %v198_v34, %v67_v22  ;;  %v337_v22 = vld [vmem:[%s1031_s1 + $0x8] sm:$0xff] }
 0x492   :  { %757 = vset.pattern.permute.xlu1 %v840_v35 }
 0x505   :  { %v202_v37 = vpop.permute.xlu0 %201 }
 0x506   :  { %v213_v38 = vadd.f32 %v212_v36, %v202_v37 }
 0x508   :  { %v215_v39 = vmin.f32 %v197_v30, %v213_v38 }
 0x509   :  { %v207_v41 = vpop.permute.xlu1 %206 }
 0x50a   :  { %v214_v42 = vadd.f32 %v212_v36, %v207_v41  ;;  %219 = vperm.xlu1 %757, %v215_v39  }
 0x50c   :  { %v216_v14 = vmin.f32 %v198_v34, %v214_v42 }
 0x50e   :  { %224 = vperm.xlu0 %758, %v216_v14   ;;  %759 = vset.pattern.permute.xlu1 %v841_v43  ;;  %v230_v45 = vrot.slane %v216_v14, %v85_v31  ;;  %v772_v31 = vld [vmem:[%s1033_s3 + $0x30] sm:$0xff]  }
 0x50f   :  { %676 = vmatpush3.bf16.msra.mxu0 %v772_v31 }
 0x510   :  { %677 = vmatprep.subr.bf16.mxu0 %v842_v54 }
 0x512   :  { %760 = vset.pattern.permute.xlu0 %v829_v3 }
 0x513   :  { %339 = vperm.xlu0 %760, %v336_v44   ;;  %678 = vmatpush3.bf16.msra.mxu0 %v773_v55 }
 0x514   :  { %679 = vmatprep.subr.bf16.mxu0 %v842_v54 }
 0x517   :  { %763 = vset.pattern.permute.xlu0 %v831_v13  ;;  %680 = vmatpush3.bf16.msra.mxu0 %v774_v56 }
 0x518   :  { %351 = vperm.xlu0 %763, %v337_v22   ;;  %697 = vmatprep.subr.bf16.mxu0 %v842_v54 }
 0x51c   :  { %765 = vset.pattern.permute.xlu0 %v845_v8 }
 0x585   :  { %v220_v46 = vpop.permute.xlu1 %219 }
 0x586   :  { %v231_v47 = vadd.f32 %v230_v45, %v220_v46 }
 0x588   :  { %v233_v48 = vmin.f32 %v215_v39, %v231_v47  ;;  %v588_v47 = vld [vmem:[%s1032_s2 + $0x8] sm:$0xff] }
 0x589   :  { %v225_v50 = vpop.permute.xlu0 %224 }
 0x58a   :  { %v232_v51 = vadd.f32 %v230_v45, %v225_v50  ;;  %237 = vperm.xlu1 %759, %v233_v48  }
 0x58c   :  { %v234_v52 = vmin.f32 %v216_v14, %v232_v51  ;;  %v587_v14 = vld [vmem:[%s1032_s2] sm:$0xff]  ;;  %s848_s2 = smov [#allocation4]  }
 0x58d   :  { %s611_s25 = sshll.u32 %s848_s2, 4  ;;  %s612_s25 = int_to_ptr.vmem [resolvable:$true] %s611_s25 }
 0x58e   :  { %242 = vperm.xlu1 %759, %v234_v52   ;;  %v248_v62 = vrot.slane %v234_v52, %v103_v40  ;;  %v340_v0 = vpop.permute.xlu0 %339  ;;  %s785_s26 = scalar_lea.vmem %s612_s25, 256  ;;  %p790_p1 = scmp.lt.s32.totalorder %s612_s25, %s612_s25 }
 0x58f   :  { %vm344_vm8 = vcmp.eq.s32.totalorder %v891_v5, %v340_v0  ;;  %p786_p0 = scmp.ne.s32.totalorder %s612_s25, %s785_s26  ;;  %p791_p2 = scmp.lt.s32.totalorder %s785_s26, %s785_s26 }
 0x591   :  { %p792_p3 = por %p791_p2, %p790_p1 }
 0x592   :  { %761 = vset.pattern.permute.xlu1 %v829_v3  ;;  %v775_v3 = vld [vmem:[%s1033_s3 + $0x18] sm:$0xff]  }
 0x593   :  { %342 = vperm.xlu1 %761, %v337_v22   ;;  %686 = vmatpush3.bf16.msra.mxu1 %v775_v3  ;;  %v352_v11 = vpop.permute.xlu0 %351  ;;  %p793_p4 = pnand %p792_p3, %p786_p0 }
 0x594   :  { %687 = vmatprep.subr.bf16.mxu1 %v842_v54  ;;  %vm354_vm5 = vcmp.eq.s32.totalorder %v626_v10, %v352_v11 }
 0x597   :  { %762 = vset.pattern.permute.xlu1 %v831_v13  ;;  %688 = vmatpush3.bf16.msra.mxu1 %v777_v57  ;;  %v847_v57 = vmov 15  }
 0x598   :  { %348 = vperm.xlu1 %762, %v336_v44   ;;  %689 = vmatprep.subr.bf16.mxu1 %v842_v54 }
 0x59b   :  { %690 = vmatpush3.bf16.msra.mxu1 %v779_v60 }
 0x59c   :  { %764 = vset.pattern.permute.xlu1 %v844_v59  ;;  %691 = vmatprep.subr.bf16.mxu1 %v842_v54 }
 0x59f   :  { %692 = vmatpush3.bf16.msra.mxu1 %v781_v61 }
 0x605   :  { %v238_v63 = vpop.permute.xlu1 %237 }
 0x606   :  { %v249_v1 = vadd.f32 %v248_v62, %v238_v63 }
 0x608   :  { %v251_v2 = vmin.f32 %v233_v48, %v249_v1 }
 0x609   :  { %v243_v7 = vpop.permute.xlu1 %242 }
 0x60a   :  { %v250_v9 = vadd.f32 %v248_v62, %v243_v7  ;;  %255 = vperm.xlu1 %764, %v251_v2  }
 0x60c   :  { %v252_v12 = vmin.f32 %v234_v52, %v250_v9 }
 0x60e   :  { %260 = vperm.xlu1 %764, %v252_v12   ;;  %v343_v15 = vpop.permute.xlu1 %342  ;;  %v266_v24 = vrot.slane %v252_v12, %v121_v49 }
 0x60f   :  { %vm345_vm6 = vcmp.eq.s32.totalorder %v891_v5, %v343_v15  ;;  %v778_v5 = vld [vmem:[%s1033_s3 + $0x50] sm:$0xff]  }
 0x610   :  { %vm356_vm7 = vmor %vm345_vm6, %vm354_vm5 }
 0x611   :  { %v358_v16 = vsel %vm356_vm7, 1.0, %v842_v54 }
 0x612   :  { %766 = vset.pattern.permute.xlu1 %v845_v8 }
 0x613   :  { %v349_v40 = vpop.permute.xlu1 %348 }
 0x614   :  { %vm353_vm9 = vcmp.eq.s32.totalorder %v626_v10, %v349_v40 }
 0x615   :  { %vm355_vm10 = vmor %vm344_vm8, %vm353_vm9 }
 0x616   :  { %v357_v18 = vsel %vm355_vm10, 1.0, %v842_v54 }
 0x617   :  { %v359_v20 = vpack.c.bf16 %v358_v16, %v357_v18 }
 0x619   :  { %682 = vmatmul.mubr.msk.bf16.vlgmr.msra.gmra.mxu0 %vm401_vm11, %v359_v20  ;;  %694 = vmatmul.mubr.msk.bf16.vlgmr.msra.gmra.mxu1 %vm401_vm11, %v359_v20 }
 0x61a   :  { %698 = vmatpush3.bf16.msra.mxu0 %v776_v19  ;;  %705 = vmatprep.mubr.msk.bf16.mxu0 %vm843_vm4, %v842_v54 }
 0x61b   :  { %699 = vmatprep.subr.bf16.mxu0 %v842_v54 }
 0x61e   :  { %700 = vmatpush3.bf16.msra.mxu0 %v778_v5 }
 0x61f   :  { %701 = vmatprep.subr.bf16.mxu0 %v842_v54 }
 0x622   :  { %702 = vmatpush3.bf16.msra.mxu0 %v780_v21 }
 0x623   :  { %703 = vmatprep.subr.bf16.mxu0 %v842_v54 }
 0x626   :  { %704 = vmatpush3.bf16.msra.mxu0 %v782_v23 }
 0x629   :  { %706 = vmatmul.mubr.msk.bf16.vlgmr.msra.gmra.mxu0 %vm401_vm11, %v359_v20 }
 0x685   :  { %v256_v25 = vpop.permute.xlu1 %255 }
 0x686   :  { %v267_v26 = vadd.f32 %v266_v24, %v256_v25 }
 0x688   :  { %v269_v27 = vmin.f32 %v251_v2, %v267_v26 }
 0x689   :  { %v261_v28 = vpop.permute.xlu1 %260 }
 0x68a   :  { %v268_v29 = vadd.f32 %v266_v24, %v261_v28  ;;  %273 = vperm.xlu0 %765, %v269_v27  }
 0x68c   :  { %v270_v30 = vmin.f32 %v252_v12, %v268_v29 }
 0x68e   :  { %278 = vperm.xlu1 %766, %v270_v30   ;;  %768 = vset.pattern.permute.xlu0 %v846_v32  ;;  %v284_v52 = vrot.slane %v270_v30, %v139_v58 }
 0x692   :  { %767 = vset.pattern.permute.xlu1 %v846_v32 }
 0x6d9   :  { %v439_v33 = vpop.f32.mrf.mxu0  ;;  %v504_v34 = vpop.f32.mrf.mxu1 }
 0x6da   :  { %v505_v49 = vadd.f32 %v504_v34, %v439_v33 }
 0x6db   :  { %v683_v35 = vpop.f32.mrf.mxu0  ;;  %v695_v36 = vpop.f32.mrf.mxu1 }
 0x6dd   :  { %v442_v37 = vpop.f32.mrf.mxu0  ;;  %v507_v38 = vpop.f32.mrf.mxu1 }
 0x6de   :  { %v508_v44 = vadd.f32 %v507_v38, %v442_v37 }
 0x6df   :  { %v684_v39 = vpop.f32.mrf.mxu0  ;;  %v696_v41 = vpop.f32.mrf.mxu1 }
 0x6e9   :  { %v578_v42 = vpop.f32.mrf.mxu0 }
 0x6ea   :  { %v585_v43 = vadd.f32 %v578_v42, %v505_v49 }
 0x6eb   :  { %v707_v22 = vpop.f32.mrf.mxu0 }
 0x6ec   :  { %v589_v45 = vadd.f32 %v587_v14, %v585_v43 }
 0x6ed   :  { %v581_v46 = vpop.f32.mrf.mxu0 }
 0x6ee   :  { %592 = vst.msk [vmem:[#allocation4] sm:$0xff] %vm591_vm12, %v589_v45  ;;  %v586_v48 = vadd.f32 %v581_v46, %v508_v44 }
 0x6ef   :  { %v708_v50 = vpop.f32.mrf.mxu0 }
 0x6f0   :  { %v590_v51 = vadd.f32 %v588_v47, %v586_v48 }
 0x6f2   :  { %593 = vst.msk [vmem:[#allocation4 + $0x8] sm:$0xff] %vm591_vm12, %v590_v51 }
 0x705   :  { %v274_v53 = vpop.permute.xlu0 %273 }
 0x706   :  { %v285_v54 = vadd.f32 %v284_v52, %v274_v53 }
 0x708   :  { %v287_v31 = vmin.f32 %v269_v27, %v285_v54 }
 0x709   :  { %v279_v55 = vpop.permute.xlu1 %278 }
 0x70a   :  { %v286_v56 = vadd.f32 %v284_v52, %v279_v55  ;;  %291 = vperm.xlu1 %767, %v287_v31  }
 0x70c   :  { %v288_v3 = vmin.f32 %v270_v30, %v286_v56 }
 0x70e   :  { %296 = vperm.xlu0 %768, %v288_v3   ;;  %769 = vset.pattern.permute.xlu1 %v847_v57  ;;  %v302_v59 = vrot.slane %v288_v3, %v157_v6 }
 0x712   :  { %770 = vset.pattern.permute.xlu0 %v831_v13 }
 0x785   :  { %v292_v60 = vpop.permute.xlu1 %291 }
 0x786   :  { %v303_v61 = vadd.f32 %v302_v59, %v292_v60 }
 0x788   :  { %v305_v62 = vmin.f32 %v287_v31, %v303_v61 }
 0x789   :  { %v297_v63 = vpop.permute.xlu0 %296 }
 0x78a   :  { %v304_v58 = vadd.f32 %v302_v59, %v297_v63  ;;  %309 = vperm.xlu1 %769, %v305_v62  }
 0x78c   :  { %v306_v0 = vmin.f32 %v288_v3, %v304_v58 }
 0x78e   :  { %314 = vperm.xlu1 %769, %v306_v0  }
 0x78f   :  { %796 = shalt.err (!%p793_p4)
}
 0x790   :  { %s849_s1 = smov 128   ;;  %s850_s27 = smov 8   ;;  %v320_v13 = vrot.slane %v306_v0, %v175_v17  ;;  %vm333_vm13 = vcmask 130048  }
 0x791   :  { %617 = dma.vmem_to_hbm [thread:$0]  %s612_s25, 256, %s1035_s5, [#allocation5], %s849_s1, %s849_s1, %s850_s27  }
 0x792   :  { %s851_s30 = smov [#allocation2]  }
 0x793   :  { %s599_s6 = sshll.u32 %s851_s30, 4  ;;  %s600_s6 = int_to_ptr.vmem [resolvable:$true] %s599_s6 }
 0x794   :  { %s805_s5 = scalar_lea.vmem %s600_s6, 256  ;;  %p810_p6 = scmp.lt.s32.totalorder %s600_s6, %s600_s6 }
 0x795   :  { %p806_p5 = scmp.ne.s32.totalorder %s600_s6, %s805_s5  ;;  %p811_p7 = scmp.lt.s32.totalorder %s805_s5, %s805_s5 }
 0x797   :  { %p812_p8 = por %p811_p7, %p810_p6 }
 0x799   :  { %p813_p9 = pnand %p812_p8, %p806_p5 }
 0x805   :  { %v310_v6 = vpop.permute.xlu1 %309 }
 0x806   :  { %v321_v1 = vadd.f32 %v320_v13, %v310_v6 }
 0x808   :  { %v323_v2 = vmin.f32 %v305_v62, %v321_v1 }
 0x809   :  { %v315_v7 = vpop.permute.xlu1 %314 }
 0x80a   :  { %v325_v8 = vmin.f32 %v323_v2, 510.0  ;;  %v322_v9 = vadd.f32 %v320_v13, %v315_v7 }
 0x80c   :  { %v709_v10 = vtrunc.f32 %v325_v8  ;;  %v324_v11 = vmin.f32 %v306_v0, %v322_v9 }
 0x80e   :  { %v710_v12 = vcvt.f32.s32 %v709_v10  ;;  %v326_v15 = vmin.f32 %v324_v11, 510.0 }
 0x810   :  { %vm329_vm14 = vcmp.ge.s32.totalorder %v710_v12, 510  ;;  %v711_v40 = vtrunc.f32 %v326_v15 }
 0x811   :  { %v331_v16 = vsel %vm329_vm14, 20, %v710_v12 }
 0x812   :  { %v712_v18 = vcvt.f32.s32 %v711_v40  ;;  %334 = vst.msk [vmem:[#allocation2] sm:$0xff] %vm333_vm13, %v331_v16 }
 0x814   :  { %vm330_vm15 = vcmp.ge.s32.totalorder %v712_v18, 510 }
 0x815   :  { %v332_v4 = vsel %vm330_vm15, 20, %v712_v18 }
 0x816   :  { %335 = vst.msk [vmem:[#allocation2 + $0x8] sm:$0xff] %vm333_vm13, %v332_v4 }
 0x817   :  { %816 = shalt.err (!%p813_p9)
}
 0x818   :  { %605 = dma.vmem_to_hbm [thread:$0]  %s600_s6, 256, %s1034_s4, [#allocation3], %s849_s1, %s849_s1, %s850_s27  }
 0x819   :  { %825 = dma.done.wait [#allocation3], 256  }
 0x81a   :  { %826 = vsyncadd [#allocation3], 4294967040 }
 0x81b   :  { %827 = dma.done.wait [#allocation5], 256  }
 0x81c   :  { %828 = vsyncadd [#allocation5], 4294967040 }
 0x81d   :  { %624 = vsyncpa [#allocation3], 1 }
 0x81e   :  { %625 = vsyncpa [#allocation5], 1 }

</bundles_post_ra>
